<compile_context>
chip_gen: v6e
topology: v6e:2x2x1
jax: 0.10.0
libtpu: 0.0.40
codegen_flags: <defaults>
</compile_context>

<pallas_src>
import jax
import jax.numpy as jnp
from jax.experimental import pallas as pl
from jax.experimental.pallas import tpu as pltpu


# --------------------------------------------------------------------------
# Kernel: o = relu(x @ w1 + b1) @ w2 + b2   (single grid axis over row tiles)
# --------------------------------------------------------------------------

def _soft_label_mlp_kernel(x_ref, w1_ref, b1_ref, w2_ref, b2_ref, o_ref):
    x = x_ref[...]                                                      # (bm, Kr)
    h = jnp.dot(x, w1_ref[...], preferred_element_type=jnp.float32)    # MXU, f32 acc
    h = jnp.maximum(h + b1_ref[...], 0.0)                              # bias + ReLU (VPU, f32)
    y = jnp.dot(h.astype(w2_ref.dtype), w2_ref[...],
                preferred_element_type=jnp.float32)                    # MXU, f32 acc
    o_ref[...] = (y + b2_ref[...]).astype(o_ref.dtype)


# --------------------------------------------------------------------------
# Wrapper
# --------------------------------------------------------------------------

def _round_up(x, m):
    return ((x + m - 1) // m) * m


def _block_diag(w, p):
    """(K, E) -> (p*K, p*E) block-diagonal with `w` repeated p times on the diagonal."""
    K, E = w.shape
    eye = jnp.eye(p, dtype=w.dtype)
    return (eye[:, None, :, None] * w[None, :, None, :]).reshape(p * K, p * E)


def soft_label_encoder(aux_data, params, *, block_m=8192):
    """aux_data: (M, aux_input_dim) -> (M, embed_dim). One fused pallas_call."""
    M, K = aux_data.shape
    E = params["w1"].shape[1]
    dtype = aux_data.dtype
    w1, b1, w2, b2 = params["w1"], params["b1"], params["w2"], params["b2"]

    # ---- lane-dense packing (wrapper-side layout plumbing) --------------------
    # Pack P consecutive rows into one 128-lane row.  The packed matmul against a
    # block-diagonal weight matrix is bit-for-bit the same per-row math (the extra
    # MAC operands are exact zeros), so no in-kernel reshape is needed.
    P = 128 // K if (0 < K <= 128 and 128 % K == 0) else 1
    pack = P > 1 and M % P == 0 and (P * E) % 128 == 0
    if pack:
        x_in = aux_data.reshape(M // P, P * K)            # identical row-major bytes
        w1_in = _block_diag(w1, P)                        # (128, P*E)
        w2_in = _block_diag(w2, P)                        # (P*E, P*E)
        b1_in = jnp.tile(b1.reshape(1, E), (1, P))        # (1, P*E)
        b2_in = jnp.tile(b2.reshape(1, E), (1, P))
    else:
        # Fallback: original (M, K)/(M, E) layout; last dims equal the full array
        # dims so the (8,128) block rule is satisfied.
        x_in, w1_in, w2_in = aux_data, w1, w2
        b1_in, b2_in = b1.reshape(1, E), b2.reshape(1, E)

    Mr, Kr = x_in.shape                 # rows / inner dim as the kernel sees them
    Er = w1_in.shape[1]                 # output width as the kernel sees it

    # ---- row-tile size ---------------------------------------------------------
    # Large tiles amortize per-grid-step overhead; cap at ceil(rows/2) so the
    # "parallel" axis has >=2 blocks for v7x's two TensorCores when possible.
    # VMEM: 2 x double-buffered (x + out) tiles at bm=8192 original rows (f32,
    # K=16/E=32) is ~3 MiB — far under the 16/32/32 MiB scoped limits, so the
    # default vmem limit and default double buffering are kept.
    bm = max(8, ((block_m // P) // 8) * 8)            # tile size in *kernel* rows
    bm = min(bm, _round_up(pl.cdiv(Mr, 2), 8))
    if bm >= Mr:
        bm = Mr                                       # single full-array block
    grid_m = pl.cdiv(Mr, bm)                          # partial boundary block is masked

    out = pl.pallas_call(
        _soft_label_mlp_kernel,
        out_shape=jax.ShapeDtypeStruct((Mr, Er), dtype),
        grid=(grid_m,),
        in_specs=[
            pl.BlockSpec((bm, Kr), lambda i: (i, 0)),   # activations: tiled over rows
            pl.BlockSpec((Kr, Er), lambda i: (0, 0)),   # w1: resident (constant block)
            pl.BlockSpec((1, Er), lambda i: (0, 0)),    # b1: resident
            pl.BlockSpec((Er, Er), lambda i: (0, 0)),   # w2: resident
            pl.BlockSpec((1, Er), lambda i: (0, 0)),    # b2: resident
        ],
        out_specs=pl.BlockSpec((bm, Er), lambda i: (i, 0)),
        compiler_params=pltpu.CompilerParams(dimension_semantics=("parallel",)),
    )(x_in, w1_in, b1_in, w2_in, b2_in)

    return out.reshape(M, E) if pack else out


# --------------------------------------------------------------------------
# Deterministic synthetic parameters (≡ nn.Sequential(Linear, ReLU, Linear))
# --------------------------------------------------------------------------

def init_params(key, aux_input_dim, embed_dim):
    k1, k2 = jax.random.split(key)
    scale = 0.05
    return {
        "w1": scale * jax.random.normal(k1, (aux_input_dim, embed_dim), dtype=jnp.float32),
        "b1": jnp.zeros((embed_dim,), jnp.float32),
        "w2": scale * jax.random.normal(k2, (embed_dim, embed_dim), dtype=jnp.float32),
        "b2": jnp.zeros((embed_dim,), jnp.float32),
    }


def reference_forward(aux_data, params):
    h = jnp.maximum(aux_data @ params["w1"] + params["b1"], 0.0)
    return h @ params["w2"] + params["b2"]


# --------------------------------------------------------------------------
# Main
# --------------------------------------------------------------------------

if __name__ == "__main__":
    aux_input_dim = 16
    embed_dim = 32
    batch = 8

    key = jax.random.PRNGKey(0)
    kp, kx = jax.random.split(key)
    params = init_params(kp, aux_input_dim, embed_dim)
    aux_data = jax.random.normal(kx, (batch, aux_input_dim), dtype=jnp.float32)

    fwd = jax.jit(soft_label_encoder)

    # 1) small batch — single full-array block, lane-dense packed path
    out = jax.block_until_ready(fwd(aux_data, params))
    assert out.shape == (batch, embed_dim), out.shape
    assert bool(jnp.all(jnp.isfinite(out)))
    ref = reference_forward(aux_data, params)
    assert jnp.allclose(out, ref, atol=1e-4, rtol=1e-4), float(jnp.max(jnp.abs(out - ref)))

    # 2) multi-block packed path (>=2 grid steps, masked partial boundary block)
    aux2 = jax.random.normal(jax.random.PRNGKey(1), (200, aux_input_dim), dtype=jnp.float32)
    out2 = jax.block_until_ready(fwd(aux2, params))
    ref2 = reference_forward(aux2, params)
    assert jnp.allclose(out2, ref2, atol=1e-4, rtol=1e-4), float(jnp.max(jnp.abs(out2 - ref2)))

    # 3) unpacked fallback (batch not a multiple of the pack factor), masked boundary
    aux3 = jax.random.normal(jax.random.PRNGKey(2), (13, aux_input_dim), dtype=jnp.float32)
    out3 = jax.block_until_ready(fwd(aux3, params))
    ref3 = reference_forward(aux3, params)
    assert jnp.allclose(out3, ref3, atol=1e-4, rtol=1e-4), float(jnp.max(jnp.abs(out3 - ref3)))

    print("KERNEL_OK")
</pallas_src>

<mosaic_0001>
module attributes {stable_mosaic.version = 11 : i64} {
  func.func @_soft_label_mlp_kernel(%arg0: i32, %arg1: memref<1x128xf32, #tpu.memory_space<vmem>>, %arg2: memref<128x256xf32, #tpu.memory_space<vmem>>, %arg3: memref<1x256xf32, #tpu.memory_space<vmem>>, %arg4: memref<256x256xf32, #tpu.memory_space<vmem>>, %arg5: memref<1x256xf32, #tpu.memory_space<vmem>>, %arg6: memref<1x256xf32, #tpu.memory_space<vmem>>) attributes {dimension_semantics = [#tpu.dimension_semantics<parallel>], iteration_bounds = array<i64: 1>, scalar_prefetch = 0 : i64, scratch_operands = 0 : i64, tpu.core_type = #tpu.core_type<tc>, window_params = [{transform_indices = @transform_0, window_bounds = array<i64: 1, 128>}, {pipeline_mode = #tpu.pipeline_mode<synchronous>, transform_indices = @transform_1, window_bounds = array<i64: 128, 256>}, {pipeline_mode = #tpu.pipeline_mode<synchronous>, transform_indices = @transform_2, window_bounds = array<i64: 1, 256>}, {pipeline_mode = #tpu.pipeline_mode<synchronous>, transform_indices = @transform_3, window_bounds = array<i64: 256, 256>}, {pipeline_mode = #tpu.pipeline_mode<synchronous>, transform_indices = @transform_4, window_bounds = array<i64: 1, 256>}, {transform_indices = @transform_5, window_bounds = array<i64: 1, 256>}]} {
    %c0 = arith.constant 0 : index
    %c0_0 = arith.constant 0 : index
    %0 = vector.load %arg1[%c0, %c0_0] : memref<1x128xf32, #tpu.memory_space<vmem>>, vector<1x128xf32>
    %c0_1 = arith.constant 0 : index
    %c0_2 = arith.constant 0 : index
    %1 = vector.load %arg2[%c0_1, %c0_2] : memref<128x256xf32, #tpu.memory_space<vmem>>, vector<128x256xf32>
    %cst = arith.constant dense<0.000000e+00> : vector<1x256xf32>
    %2 = tpu.matmul %0, %1, %cst {dimension_numbers = #tpu.dot_dimension_numbers<[1], [0], [0], [1], [0, 0, 1, 1], [], []>} : vector<1x128xf32>, vector<128x256xf32>, vector<1x256xf32> -> vector<1x256xf32>
    %c0_3 = arith.constant 0 : index
    %c0_4 = arith.constant 0 : index
    %3 = vector.load %arg3[%c0_3, %c0_4] : memref<1x256xf32, #tpu.memory_space<vmem>>, vector<1x256xf32>
    %4 = arith.addf %2, %3 : vector<1x256xf32>
    %cst_5 = arith.constant 0.000000e+00 : f32
    %5 = vector.broadcast %cst_5 : f32 to vector<1x256xf32>
    %6 = arith.maximumf %4, %5 : vector<1x256xf32>
    %c0_6 = arith.constant 0 : index
    %c0_7 = arith.constant 0 : index
    %7 = vector.load %arg4[%c0_6, %c0_7] : memref<256x256xf32, #tpu.memory_space<vmem>>, vector<256x256xf32>
    %cst_8 = arith.constant dense<0.000000e+00> : vector<1x256xf32>
    %8 = tpu.matmul %6, %7, %cst_8 {dimension_numbers = #tpu.dot_dimension_numbers<[1], [0], [0], [1], [0, 0, 1, 1], [], []>} : vector<1x256xf32>, vector<256x256xf32>, vector<1x256xf32> -> vector<1x256xf32>
    %c0_9 = arith.constant 0 : index
    %c0_10 = arith.constant 0 : index
    %9 = vector.load %arg5[%c0_9, %c0_10] : memref<1x256xf32, #tpu.memory_space<vmem>>, vector<1x256xf32>
    %10 = arith.addf %8, %9 : vector<1x256xf32>
    %c0_11 = arith.constant 0 : index
    %c0_12 = arith.constant 0 : index
    %11 = vector.load %arg6[%c0_11, %c0_12] : memref<1x256xf32, #tpu.memory_space<vmem>>, vector<1x256xf32>
    tpu.vector_store %arg6[%c0_11, %c0_12], %10 {strides = array<i32>} : memref<1x256xf32, #tpu.memory_space<vmem>>, vector<1x256xf32>,
    return
  }
  func.func @transform_0(%arg0: i32) -> (i32, i32) {
    %c0_i32 = arith.constant 0 : i32
    %c0_i32_0 = arith.constant 0 : i32
    return %arg0, %c0_i32 : i32, i32
  }
  func.func @transform_1(%arg0: i32) -> (i32, i32) {
    %c0_i32 = arith.constant 0 : i32
    %c0_i32_0 = arith.constant 0 : i32
    %c0_i32_1 = arith.constant 0 : i32
    return %c0_i32, %c0_i32_0 : i32, i32
  }
  func.func @transform_2(%arg0: i32) -> (i32, i32) {
    %c0_i32 = arith.constant 0 : i32
    %c0_i32_0 = arith.constant 0 : i32
    %c0_i32_1 = arith.constant 0 : i32
    return %c0_i32, %c0_i32_0 : i32, i32
  }
  func.func @transform_3(%arg0: i32) -> (i32, i32) {
    %c0_i32 = arith.constant 0 : i32
    %c0_i32_0 = arith.constant 0 : i32
    %c0_i32_1 = arith.constant 0 : i32
    return %c0_i32, %c0_i32_0 : i32, i32
  }
  func.func @transform_4(%arg0: i32) -> (i32, i32) {
    %c0_i32 = arith.constant 0 : i32
    %c0_i32_0 = arith.constant 0 : i32
    %c0_i32_1 = arith.constant 0 : i32
    return %c0_i32, %c0_i32_0 : i32, i32
  }
  func.func @transform_5(%arg0: i32) -> (i32, i32) {
    %c0_i32 = arith.constant 0 : i32
    %c0_i32_0 = arith.constant 0 : i32
    return %arg0, %c0_i32 : i32, i32
  }
}

</mosaic_0001>

<bundles_post_ra>
// kernel: soft_label_encoder.1
= control target key start
LH: loop header
LB: loop body
LE: loop exit
PB: predicated region body
PF: predicated region fallthrough
CT: control target
= control target key end

     0   :  { %v314_v3 = vmov 0.0   ;;  %s646_s1 = inlined_call_operand.vmem [shape: f32[128,256], index: 1, kind: input, shape index: {}]   ;;  %s647_s3 = inlined_call_operand.vmem [shape: f32[256,256], index: 3, kind: input, shape index: {}]   ;;  %s648_s0 = inlined_call_operand.vmem [shape: f32[1,128], index: 0, kind: input, shape index: {}]   ;;  %s649_s2 = inlined_call_operand.vmem [shape: f32[1,256], index: 2, kind: input, shape index: {}]   ;;  %s650_s4 = inlined_call_operand.vmem [shape: f32[1,256], index: 4, kind: input, shape index: {}]   ;;  %s651_s5 = inlined_call_operand.vmem [shape: f32[1,256], index: 5, kind: output, shape index: {}]  }
   0x1   :  { %v52_v0 = vld [vmem:[%s646_s1 + $0xf8] sm:$0xff]  ;;  %v51_v1 = vld [vmem:[%s646_s1 + $0xf0] sm:$0xff]  ;;  %v50_v2 = vld [vmem:[%s646_s1 + $0xe8] sm:$0xff]  ;;  %129 = vmatprep.mubr.f32.mxu0 %v314_v3 }
   0x2   :  { %65 = vmatprep.subr.mxu0 %v52_v0  ;;  %v49_v4 = vld [vmem:[%s646_s1 + $0xe0] sm:$0xff]  ;;  %v48_v5 = vld [vmem:[%s646_s1 + $0xd8] sm:$0xff]  ;;  %v47_v6 = vld [vmem:[%s646_s1 + $0xd0] sm:$0xff] }
   0x3   :  { %66 = vmatpush1.msra.mxu0 %v51_v1  ;;  %v46_v7 = vld [vmem:[%s646_s1 + $0xc8] sm:$0xff]  ;;  %v45_v8 = vld [vmem:[%s646_s1 + $0xc0] sm:$0xff]  ;;  %v44_v9 = vld [vmem:[%s646_s1 + $0xb8] sm:$0xff] }
   0x4   :  { %67 = vmatprep.subr.mxu0 %v50_v2  ;;  %v43_v10 = vld [vmem:[%s646_s1 + $0xb0] sm:$0xff]  ;;  %v42_v11 = vld [vmem:[%s646_s1 + $0xa8] sm:$0xff]  ;;  %v41_v12 = vld [vmem:[%s646_s1 + $0xa0] sm:$0xff] }
   0x5   :  { %68 = vmatpush1.msra.mxu0 %v49_v4  ;;  %v40_v13 = vld [vmem:[%s646_s1 + $0x98] sm:$0xff]  ;;  %v39_v14 = vld [vmem:[%s646_s1 + $0x90] sm:$0xff]  ;;  %v167_v17 = vld [vmem:[%s647_s3 + $0xe8] sm:$0xff] }
   0x6   :  { %69 = vmatprep.subr.mxu0 %v48_v5  ;;  %v169_v15 = vld [vmem:[%s647_s3 + $0xf8] sm:$0xff]  ;;  %v168_v16 = vld [vmem:[%s647_s3 + $0xf0] sm:$0xff]  ;;  %v38_v18 = vld [vmem:[%s646_s1 + $0x88] sm:$0xff] }
   0x7   :  { %70 = vmatpush1.msra.mxu0 %v47_v6  ;;  %214 = vmatprep.subr.mxu1 %v169_v15  ;;  %v166_v19 = vld [vmem:[%s647_s3 + $0xe0] sm:$0xff]  ;;  %v165_v21 = vld [vmem:[%s647_s3 + $0xd8] sm:$0xff]  ;;  %v164_v23 = vld [vmem:[%s647_s3 + $0xd0] sm:$0xff] }
   0x8   :  { %71 = vmatprep.subr.mxu0 %v46_v7  ;;  %v37_v20 = vld [vmem:[%s646_s1 + $0x80] sm:$0xff]  ;;  %215 = vmatpush1.msra.mxu1 %v168_v16  ;;  %v36_v22 = vld [vmem:[%s646_s1 + $0x78] sm:$0xff]  ;;  %v35_v24 = vld [vmem:[%s646_s1 + $0x70] sm:$0xff] }
   0x9   :  { %72 = vmatpush1.msra.mxu0 %v45_v8  ;;  %216 = vmatprep.subr.mxu1 %v167_v17  ;;  %v163_v25 = vld [vmem:[%s647_s3 + $0xc8] sm:$0xff]  ;;  %v162_v27 = vld [vmem:[%s647_s3 + $0xc0] sm:$0xff]  ;;  %v161_v29 = vld [vmem:[%s647_s3 + $0xb8] sm:$0xff] }
   0xa   :  { %73 = vmatprep.subr.mxu0 %v44_v9  ;;  %217 = vmatpush1.msra.mxu1 %v166_v19  ;;  %v34_v26 = vld [vmem:[%s646_s1 + $0x68] sm:$0xff]  ;;  %v33_v28 = vld [vmem:[%s646_s1 + $0x60] sm:$0xff]  ;;  %v32_v30 = vld [vmem:[%s646_s1 + $0x58] sm:$0xff] }
   0xb   :  { %74 = vmatpush1.msra.mxu0 %v43_v10  ;;  %218 = vmatprep.subr.mxu1 %v165_v21  ;;  %v160_v31 = vld [vmem:[%s647_s3 + $0xb0] sm:$0xff]  ;;  %v159_v33 = vld [vmem:[%s647_s3 + $0xa8] sm:$0xff]  ;;  %v158_v35 = vld [vmem:[%s647_s3 + $0xa0] sm:$0xff] }
   0xc   :  { %75 = vmatprep.subr.mxu0 %v42_v11  ;;  %219 = vmatpush1.msra.mxu1 %v164_v23  ;;  %v31_v32 = vld [vmem:[%s646_s1 + $0x50] sm:$0xff]  ;;  %v30_v34 = vld [vmem:[%s646_s1 + $0x48] sm:$0xff]  ;;  %v29_v36 = vld [vmem:[%s646_s1 + $0x40] sm:$0xff] }
   0xd   :  { %76 = vmatpush1.msra.mxu0 %v41_v12  ;;  %220 = vmatprep.subr.mxu1 %v163_v25  ;;  %v157_v37 = vld [vmem:[%s647_s3 + $0x98] sm:$0xff]  ;;  %v156_v39 = vld [vmem:[%s647_s3 + $0x90] sm:$0xff]  ;;  %v155_v41 = vld [vmem:[%s647_s3 + $0x88] sm:$0xff] }
   0xe   :  { %77 = vmatprep.subr.mxu0 %v40_v13  ;;  %221 = vmatpush1.msra.mxu1 %v162_v27  ;;  %v28_v38 = vld [vmem:[%s646_s1 + $0x38] sm:$0xff]  ;;  %v27_v40 = vld [vmem:[%s646_s1 + $0x30] sm:$0xff]  ;;  %v26_v42 = vld [vmem:[%s646_s1 + $0x28] sm:$0xff] }
   0xf   :  { %78 = vmatpush1.msra.mxu0 %v39_v14  ;;  %222 = vmatprep.subr.mxu1 %v161_v29  ;;  %v154_v43 = vld [vmem:[%s647_s3 + $0x80] sm:$0xff]  ;;  %v153_v45 = vld [vmem:[%s647_s3 + $0x78] sm:$0xff]  ;;  %v152_v47 = vld [vmem:[%s647_s3 + $0x70] sm:$0xff] }
  0x10   :  { %79 = vmatprep.subr.mxu0 %v38_v18  ;;  %223 = vmatpush1.msra.mxu1 %v160_v31  ;;  %v25_v44 = vld [vmem:[%s646_s1 + $0x20] sm:$0xff]  ;;  %v24_v46 = vld [vmem:[%s646_s1 + $0x18] sm:$0xff]  ;;  %v23_v48 = vld [vmem:[%s646_s1 + $0x10] sm:$0xff] }
  0x11   :  { %80 = vmatpush1.msra.mxu0 %v37_v20  ;;  %224 = vmatprep.subr.mxu1 %v159_v33  ;;  %v151_v49 = vld [vmem:[%s647_s3 + $0x68] sm:$0xff]  ;;  %v150_v51 = vld [vmem:[%s647_s3 + $0x60] sm:$0xff]  ;;  %v149_v53 = vld [vmem:[%s647_s3 + $0x58] sm:$0xff] }
  0x12   :  { %81 = vmatprep.subr.mxu0 %v36_v22  ;;  %225 = vmatpush1.msra.mxu1 %v158_v35  ;;  %v22_v50 = vld [vmem:[%s646_s1 + $0x8] sm:$0xff]  ;;  %v21_v52 = vld [vmem:[%s646_s1] sm:$0xff]  ;;  %v148_v55 = vld [vmem:[%s647_s3 + $0x50] sm:$0xff] }
  0x13   :  { %82 = vmatpush1.msra.mxu0 %v35_v24  ;;  %226 = vmatprep.subr.mxu1 %v157_v37  ;;  %v20_v54 = vld [vmem:[%s648_s0] sm:$0x1]  ;;  %v147_v56 = vld [vmem:[%s647_s3 + $0x48] sm:$0xff]  ;;  %v145_v58 = vld [vmem:[%s647_s3 + $0x38] sm:$0xff] }
  0x14   :  { %83 = vmatprep.subr.mxu0 %v34_v26  ;;  %227 = vmatpush1.msra.mxu1 %v156_v39  ;;  %v146_v57 = vld [vmem:[%s647_s3 + $0x40] sm:$0xff]  ;;  %v144_v59 = vld [vmem:[%s647_s3 + $0x30] sm:$0xff]  ;;  %v143_v60 = vld [vmem:[%s647_s3 + $0x28] sm:$0xff] }
  0x15   :  { %84 = vmatpush1.msra.mxu0 %v33_v28  ;;  %228 = vmatprep.subr.mxu1 %v155_v41  ;;  %v142_v61 = vld [vmem:[%s647_s3 + $0x20] sm:$0xff]  ;;  %v141_v62 = vld [vmem:[%s647_s3 + $0x18] sm:$0xff]  ;;  %v140_v63 = vld [vmem:[%s647_s3 + $0x10] sm:$0xff] }
  0x16   :  { %85 = vmatprep.subr.mxu0 %v32_v30  ;;  %229 = vmatpush1.msra.mxu1 %v154_v43  ;;  %v139_v0 = vld [vmem:[%s647_s3 + $0x8] sm:$0xff]  ;;  %v138_v1 = vld [vmem:[%s647_s3] sm:$0xff]  ;;  %v201_v2 = vld [vmem:[%s647_s3 + $0x1f8] sm:$0xff] }
  0x17   :  { %86 = vmatpush1.msra.mxu0 %v31_v32  ;;  %230 = vmatprep.subr.mxu1 %v153_v45  ;;  %v200_v3 = vld [vmem:[%s647_s3 + $0x1f0] sm:$0xff]  ;;  %v199_v4 = vld [vmem:[%s647_s3 + $0x1e8] sm:$0xff]  ;;  %v198_v5 = vld [vmem:[%s647_s3 + $0x1e0] sm:$0xff] }
  0x18   :  { %87 = vmatprep.subr.mxu0 %v30_v34  ;;  %231 = vmatpush1.msra.mxu1 %v152_v47  ;;  %v197_v6 = vld [vmem:[%s647_s3 + $0x1d8] sm:$0xff]  ;;  %v196_v7 = vld [vmem:[%s647_s3 + $0x1d0] sm:$0xff]  ;;  %v195_v8 = vld [vmem:[%s647_s3 + $0x1c8] sm:$0xff]  ;;  %v55_v34 = vlaneseq  ;;  %v315_v47 = vmov 1966171168  }
  0x19   :  { %88 = vmatpush1.msra.mxu0 %v29_v36  ;;  %232 = vmatprep.subr.mxu1 %v151_v49  ;;  %v194_v9 = vld [vmem:[%s647_s3 + $0x1c0] sm:$0xff]  ;;  %v193_v10 = vld [vmem:[%s647_s3 + $0x1b8] sm:$0xff]  ;;  %v192_v11 = vld [vmem:[%s647_s3 + $0x1b0] sm:$0xff] }
  0x1a   :  { %89 = vmatprep.subr.mxu0 %v28_v38  ;;  %233 = vmatpush1.msra.mxu1 %v150_v51  ;;  %v191_v12 = vld [vmem:[%s647_s3 + $0x1a8] sm:$0xff]  ;;  %v190_v13 = vld [vmem:[%s647_s3 + $0x1a0] sm:$0xff]  ;;  %v189_v14 = vld [vmem:[%s647_s3 + $0x198] sm:$0xff]  ;;  %v56_v35 = vshrl.u32 %v55_v34, 7  ;;  %vm305_vm0 = vcmp.lt.s32.totalorder %v55_v34, 256 }
  0x1b   :  { %90 = vmatpush1.msra.mxu0 %v27_v40  ;;  %234 = vmatprep.subr.mxu1 %v149_v53  ;;  %v188_v15 = vld [vmem:[%s647_s3 + $0x190] sm:$0xff]  ;;  %v187_v16 = vld [vmem:[%s647_s3 + $0x188] sm:$0xff]  ;;  %v186_v17 = vld [vmem:[%s647_s3 + $0x180] sm:$0xff] }
  0x1c   :  { %91 = vmatprep.subr.mxu0 %v26_v42  ;;  %235 = vmatpush1.msra.mxu1 %v148_v55  ;;  %v185_v18 = vld [vmem:[%s647_s3 + $0x178] sm:$0xff]  ;;  %v184_v19 = vld [vmem:[%s647_s3 + $0x170] sm:$0xff]  ;;  %v183_v20 = vld [vmem:[%s647_s3 + $0x168] sm:$0xff]  ;;  %v57_v36 = vsub.s32 0, %v56_v35  ;;  %v61_v38 = vsub.s32 1, %v56_v35 }
  0x1d   :  { %92 = vmatpush1.msra.mxu0 %v25_v44  ;;  %236 = vmatprep.subr.mxu1 %v147_v56  ;;  %v182_v21 = vld [vmem:[%s647_s3 + $0x160] sm:$0xff]  ;;  %v181_v22 = vld [vmem:[%s647_s3 + $0x158] sm:$0xff]  ;;  %v180_v23 = vld [vmem:[%s647_s3 + $0x150] sm:$0xff] }
  0x1e   :  { %93 = vmatprep.subr.mxu0 %v24_v46  ;;  %237 = vmatpush1.msra.mxu1 %v146_v57  ;;  %v179_v24 = vld [vmem:[%s647_s3 + $0x148] sm:$0xff]  ;;  %v178_v25 = vld [vmem:[%s647_s3 + $0x140] sm:$0xff]  ;;  %v177_v26 = vld [vmem:[%s647_s3 + $0x138] sm:$0xff] }
  0x1f   :  { %94 = vmatpush1.msra.mxu0 %v23_v48  ;;  %238 = vmatprep.subr.mxu1 %v145_v58  ;;  %v176_v27 = vld [vmem:[%s647_s3 + $0x130] sm:$0xff]  ;;  %v175_v28 = vld [vmem:[%s647_s3 + $0x128] sm:$0xff]  ;;  %v174_v29 = vld [vmem:[%s647_s3 + $0x120] sm:$0xff]  ;;  %v289_v48 = vunpack.c.l.s4 %v315_v47 }
  0x20   :  { %95 = vmatprep.subr.mxu0 %v22_v50  ;;  %239 = vmatpush1.msra.mxu1 %v144_v59  ;;  %v173_v30 = vld [vmem:[%s647_s3 + $0x118] sm:$0xff]  ;;  %v172_v31 = vld [vmem:[%s647_s3 + $0x110] sm:$0xff]  ;;  %v171_v32 = vld [vmem:[%s647_s3 + $0x108] sm:$0xff] }
  0x21   :  { %96 = vmatpush1.msra.mxu0 %v21_v52  ;;  %240 = vmatprep.subr.mxu1 %v143_v60  ;;  %v170_v33 = vld [vmem:[%s647_s3 + $0x100] sm:$0xff]  ;;  %v290_v52 = vunpack.c.0.s8 %v289_v48 }
  0x22   :  { %130 = vmatmul.mubr.f32.vlgmr.msra.gmra.mxu0 %v20_v54  ;;  %241 = vmatpush1.msra.mxu1 %v142_v61  ;;  %v53_v37 = vld [vmem:[%s649_s2] sm:$0x3] }
  0x23   :  { %242 = vmatprep.subr.mxu1 %v141_v62  ;;  %v58_v39 = vrot.slane %v53_v37, %v57_v36  ;;  %v62_v40 = vrot.slane %v53_v37, %v61_v38  ;;  %v202_v49 = vld [vmem:[%s650_s4] sm:$0x3]  ;;  %v293_v57 = vsub.s32 %v290_v52, %v56_v35 }
  0x24   :  { %243 = vmatpush1.msra.mxu1 %v140_v63  ;;  %v207_v50 = vrot.slane %v202_v49, %v57_v36  ;;  %v211_v51 = vrot.slane %v202_v49, %v61_v38 }
  0x25   :  { %244 = vmatprep.subr.mxu1 %v139_v0 }
  0x26   :  { %245 = vmatpush1.msra.mxu1 %v138_v1 }
  0x27   :  { %246 = vmatprep.subr.mxu1 %v201_v2 }
  0x28   :  { %247 = vmatpush2.msra.mxu1 %v200_v3 }
  0x29   :  { %248 = vmatprep.subr.mxu1 %v199_v4 }
  0x2a   :  { %249 = vmatpush2.msra.mxu1 %v198_v5 }
  0x2b   :  { %250 = vmatprep.subr.mxu1 %v197_v6 }
  0x2c   :  { %251 = vmatpush2.msra.mxu1 %v196_v7 }
  0x2d   :  { %252 = vmatprep.subr.mxu1 %v195_v8 }
  0x2e   :  { %253 = vmatpush2.msra.mxu1 %v194_v9 }
  0x2f   :  { %254 = vmatprep.subr.mxu1 %v193_v10 }
  0x30   :  { %255 = vmatpush2.msra.mxu1 %v192_v11 }
  0x31   :  { %256 = vmatprep.subr.mxu1 %v191_v12 }
  0x32   :  { %257 = vmatpush2.msra.mxu1 %v190_v13 }
  0x33   :  { %258 = vmatprep.subr.mxu1 %v189_v14 }
  0x34   :  { %259 = vmatpush2.msra.mxu1 %v188_v15 }
  0x35   :  { %260 = vmatprep.subr.mxu1 %v187_v16 }
  0x36   :  { %261 = vmatpush2.msra.mxu1 %v186_v17 }
  0x37   :  { %262 = vmatprep.subr.mxu1 %v185_v18 }
  0x38   :  { %263 = vmatpush2.msra.mxu1 %v184_v19 }
  0x39   :  { %264 = vmatprep.subr.mxu1 %v183_v20 }
  0x3a   :  { %265 = vmatpush2.msra.mxu1 %v182_v21 }
  0x3b   :  { %266 = vmatprep.subr.mxu1 %v181_v22 }
  0x3c   :  { %267 = vmatpush2.msra.mxu1 %v180_v23 }
  0x3d   :  { %268 = vmatprep.subr.mxu1 %v179_v24 }
  0x3e   :  { %269 = vmatpush2.msra.mxu1 %v178_v25 }
  0x3f   :  { %270 = vmatprep.subr.mxu1 %v177_v26 }
  0x40   :  { %271 = vmatpush2.msra.mxu1 %v176_v27 }
  0x41   :  { %272 = vmatprep.subr.mxu1 %v175_v28 }
  0x42   :  { %273 = vmatpush2.msra.mxu1 %v174_v29 }
  0x43   :  { %274 = vmatprep.subr.mxu1 %v173_v30 }
  0x44   :  { %275 = vmatpush2.msra.mxu1 %v172_v31 }
  0x45   :  { %276 = vmatprep.subr.mxu1 %v171_v32 }
  0x46   :  { %277 = vmatpush2.msra.mxu1 %v170_v33 }
  0xe2   :  { %v131_v41 = vpop.f32.mrf.mxu0 }
  0xe3   :  { %v132_v42 = vadd.f32 %v131_v41, %v58_v39 }
  0xe4   :  { %v133_v43 = vpop.f32.mrf.mxu0 }
  0xe5   :  { %v134_v44 = vadd.f32 %v133_v43, %v62_v40  ;;  %v136_v46 = vmax.f32 %v132_v42, 0.0 }
  0xe7   :  { %v137_v45 = vmax.f32 %v134_v44, 0.0 }
  0xe9   :  { %278 = vmatprep.mubr.f32.mxu1 %v137_v45 }
  0xea   :  { %279 = vmatmul.mubr.f32.vlgmr.msra.gmra.mxu1 %v136_v46 }
 0x1aa   :  { %v280_v53 = vpop.f32.mrf.mxu1 }
 0x1ab   :  { %v281_v55 = vadd.f32 %v280_v53, %v207_v50 }
 0x1ac   :  { %v282_v54 = vpop.f32.mrf.mxu1 }
 0x1ad   :  { %v283_v56 = vadd.f32 %v282_v54, %v211_v51 }
 0x1af   :  { %v287_v58 = vcombine.low %v281_v55, %v283_v56 }
 0x1b1   :  { %v294_v59 = vrot.slane %v287_v58, %v293_v57 }
 0x1b3   :  { %v301_v60 = vrot.slane %v294_v59, %v293_v57 }
 0x1b5   :  { %307 = vst.msk [vmem:[%s651_s5] sm:$0x3] %vm305_vm0, %v301_v60 }

</bundles_post_ra>
